<compile_context>
chip_gen: v7x
topology: tpu7x:2x2x1
jax: 0.10.0
libtpu: 0.0.40
codegen_flags: <defaults>
</compile_context>

<pallas_src>
import functools

import jax
import jax.numpy as jnp
from jax.experimental import pallas as pl
from jax.experimental.pallas import tpu as pltpu


def _round_up(n: int, m: int) -> int:
    return ((n + m - 1) // m) * m


def _batch_tiling(batch: int):
    """Pick (tile_rows, num_tiles) for the 1-D batch grid.

    * B <= 1024: one full-array tile (no padding, no waste).
    * B <= 4096: two tiles (v7x megacore gets >=2 grid steps), <=31 overhang rows.
    * larger B : biggest of {2048,1536,1024,768,512} whose zero-row overhang
                 stays under ~6% of B.
    Overhang rows are never materialized by the wrapper: the kernel output just
    has num_tiles*tile_rows rows, the ragged read of the last x tile is clamped
    by Pallas, and the extra rows are sliced off after the call.
    """
    if batch <= 1024:
        return batch, 1
    if batch <= 4096:
        tb = _round_up((batch + 1) // 2, 16)
        return tb, 2
    for tb in (2048, 1536, 1024, 768, 512):
        if (-batch) % tb <= batch // 16:
            return tb, (batch + tb - 1) // tb
    return 512, (batch + 511) // 512


def newblock_kernel(x_ref, w1_ref, shift_ref, w2_ref, b2_ref, o_ref):
    # fc1 (BN scale pre-folded into W1'): bf16 MXU operands, f32 accumulation.
    h = jnp.dot(x_ref[...].astype(jnp.bfloat16),
                w1_ref[...].astype(jnp.bfloat16),
                preferred_element_type=jnp.float32)
    # Folded bias chain (b1*scale + beta - mean*scale), f32 VPU add.
    h = h + shift_ref[...]
    # LeakyReLU(negative_slope=0.1): mul + max (cheaper than cmp + select).
    h = jnp.maximum(h, 0.1 * h)
    # TODO(synk): Dropout(p=0.5) is identity in eval mode; a training-mode path
    # would need pltpu.prng_seed / pltpu.prng_random_bits.
    # classifier: bf16 MXU operands, f32 accumulation, lane-dense bf16 store.
    out = jnp.dot(h.astype(jnp.bfloat16), w2_ref[...],
                  preferred_element_type=jnp.float32)
    o_ref[...] = (out + b2_ref[...]).astype(o_ref.dtype)


def newblock_forward(x, w1, b1, gamma, beta, run_mean, run_var, w2, b2,
                     eps=1e-5):
    """Inference-only forward. x: [B, input_dim] f32 -> [B, num_classes] f32."""
    B, Din = x.shape
    Dbn = w1.shape[1]
    C = w2.shape[1]

    # ---- fold BatchNorm1d(eval) + b1 into W1' and one per-feature shift ------
    scale = gamma / jnp.sqrt(run_var + eps)                 # [Dbn]
    shift = b1 * scale + (beta - run_mean * scale)          # [Dbn]
    w1f = w1 * scale[None, :]                               # [Din, Dbn], f32
    # NOTE: with pathological (tiny) running_var the folded scale is large and
    # the in-kernel bf16 cast of W1' becomes the precision limiter; drop the
    # .astype on w1_ref in the kernel to run that dot in f32 if trained stats
    # ever need it (compute is nowhere near the bottleneck here).

    # ---- pad only weight-sized dims ------------------------------------------
    Dp = _round_up(Dbn, 128)            # hidden dim (MXU-friendly)
    Cp = _round_up(C, 128)              # lane-dense output width
    # K (=Din) and the batch dim of x are deliberately left untouched.

    w1_p = jnp.pad(w1f, ((0, 0), (0, Dp - Dbn)))                     # f32
    shift_p = jnp.pad(shift, (0, Dp - Dbn)).reshape(1, Dp)           # f32
    w2_p = jnp.pad(w2, ((0, Dp - Dbn), (0, Cp - C))).astype(jnp.bfloat16)
    b2_p = jnp.pad(b2, (0, Cp - C)).reshape(1, Cp)                   # f32

    TB, n_tiles = _batch_tiling(B)
    Bp = TB * n_tiles                   # rows of the (bf16) kernel output

    resident = lambda shape: pl.BlockSpec(shape, lambda i: (0, 0))
    if n_tiles >= 3:
        # Deeper input buffering keeps the DMA engine ahead of the single-TC
        # loop on bandwidth-poor v5e; the extra VMEM buffer is trivial.
        x_spec = pl.BlockSpec((TB, Din), lambda i: (i, 0),
                              pipeline_mode=pl.Buffered(3))
    else:
        x_spec = pl.BlockSpec((TB, Din), lambda i: (i, 0))

    flops = 2 * Bp * (Din * Dp + Dp * Cp)
    bytes_accessed = (B * Din * 4          # x (f32, unpadded)
                      + w1_p.size * 4 + shift_p.size * 4
                      + w2_p.size * 2 + b2_p.size * 4
                      + Bp * Cp * 2)       # bf16 output

    out_p = pl.pallas_call(
        newblock_kernel,
        out_shape=jax.ShapeDtypeStruct((Bp, Cp), jnp.bfloat16),
        grid=(n_tiles,),
        in_specs=[
            x_spec,                       # streamed batch tiles (f32, K=Din)
            resident((Din, Dp)),          # W1' (resident, f32)
            resident((1, Dp)),            # folded shift (f32)
            resident((Dp, Cp)),           # W2 (resident, bf16)
            resident((1, Cp)),            # b2 (f32)
        ],
        out_specs=pl.BlockSpec((TB, Cp), lambda i: (i, 0)),
        compiler_params=pltpu.CompilerParams(
            dimension_semantics=("parallel",)),
        cost_estimate=pl.CostEstimate(flops=flops, transcendentals=0,
                                      bytes_accessed=bytes_accessed),
    )(x, w1_p, shift_p, w2_p, b2_p)

    return out_p[:B, :C].astype(jnp.float32)


def init_params(key, input_dim, num_bottlenecks, num_classes):
    """Deterministic init mirroring init_fc / init_classifier / BN defaults."""
    k1, k2, k3, k4 = jax.random.split(key, 4)
    # Linear1: kaiming_normal_ mode='fan_out' (a=0 -> gain sqrt(2)),
    # stored transposed as [in, out].
    std1 = (2.0 / num_bottlenecks) ** 0.5
    w1 = std1 * jax.random.normal(k1, (input_dim, num_bottlenecks), jnp.float32)
    # Linear bias keeps PyTorch default U(-1/sqrt(fan_in), 1/sqrt(fan_in)).
    bound1 = 1.0 / (input_dim ** 0.5)
    b1 = jax.random.uniform(k2, (num_bottlenecks,), jnp.float32,
                            -bound1, bound1)
    # BatchNorm1d: weight ~ N(1, 0.02), bias = 0, running stats = (0, 1).
    gamma = 1.0 + 0.02 * jax.random.normal(k3, (num_bottlenecks,), jnp.float32)
    beta = jnp.zeros((num_bottlenecks,), jnp.float32)
    run_mean = jnp.zeros((num_bottlenecks,), jnp.float32)
    run_var = jnp.ones((num_bottlenecks,), jnp.float32)
    # Classifier Linear: weight ~ N(0, 0.001), bias = 0; stored [in, out].
    w2 = 0.001 * jax.random.normal(k4, (num_bottlenecks, num_classes),
                                   jnp.float32)
    b2 = jnp.zeros((num_classes,), jnp.float32)
    return w1, b1, gamma, beta, run_mean, run_var, w2, b2


if __name__ == "__main__":
    B, input_dim, num_bottlenecks, num_classes = 8, 64, 512, 16

    key = jax.random.PRNGKey(0)
    kx, kp = jax.random.split(key)
    x = jax.random.normal(kx, (B, input_dim), jnp.float32)
    params = init_params(kp, input_dim, num_bottlenecks, num_classes)

    fwd = jax.jit(functools.partial(newblock_forward, eps=1e-5))
    out = jax.block_until_ready(fwd(x, *params))

    # Sanity check against a pure-JAX f32 reference of the same math.
    w1, b1, gamma, beta, run_mean, run_var, w2, b2 = params
    h_ref = x @ w1 + b1
    h_ref = (h_ref - run_mean) / jnp.sqrt(run_var + 1e-5) * gamma + beta
    h_ref = jnp.where(h_ref >= 0, h_ref, 0.1 * h_ref)
    ref = h_ref @ w2 + b2
    assert out.shape == (B, num_classes)
    # bf16 MXU operands / bf16 output stream with f32 accumulation: small slack.
    assert jnp.allclose(out, ref, atol=2e-3, rtol=2e-2), \
        float(jnp.max(jnp.abs(out - ref)))

    print("KERNEL_OK")
</pallas_src>

<mosaic_0001>
module attributes {stable_mosaic.version = 11 : i64} {
  func.func @newblock_kernel(%arg0: i32, %arg1: memref<8x64xf32, #tpu.memory_space<vmem>>, %arg2: memref<64x512xf32, #tpu.memory_space<vmem>>, %arg3: memref<1x512xf32, #tpu.memory_space<vmem>>, %arg4: memref<512x128xbf16, #tpu.memory_space<vmem>>, %arg5: memref<1x128xf32, #tpu.memory_space<vmem>>, %arg6: memref<8x128xbf16, #tpu.memory_space<vmem>>) attributes {dimension_semantics = [#tpu.dimension_semantics<parallel>], iteration_bounds = array<i64: 1>, scalar_prefetch = 0 : i64, scratch_operands = 0 : i64, tpu.core_type = #tpu.core_type<tc>, window_params = [{transform_indices = @transform_0, window_bounds = array<i64: 8, 64>}, {pipeline_mode = #tpu.pipeline_mode<synchronous>, transform_indices = @transform_1, window_bounds = array<i64: 64, 512>}, {pipeline_mode = #tpu.pipeline_mode<synchronous>, transform_indices = @transform_2, window_bounds = array<i64: 1, 512>}, {pipeline_mode = #tpu.pipeline_mode<synchronous>, transform_indices = @transform_3, window_bounds = array<i64: 512, 128>}, {pipeline_mode = #tpu.pipeline_mode<synchronous>, transform_indices = @transform_4, window_bounds = array<i64: 1, 128>}, {transform_indices = @transform_5, window_bounds = array<i64: 8, 128>}]} {
    %c0 = arith.constant 0 : index
    %c0_0 = arith.constant 0 : index
    %0 = vector.load %arg1[%c0, %c0_0] : memref<8x64xf32, #tpu.memory_space<vmem>>, vector<8x64xf32>
    %1 = arith.truncf %0 : vector<8x64xf32> to vector<8x64xbf16>
    %c0_1 = arith.constant 0 : index
    %c0_2 = arith.constant 0 : index
    %2 = vector.load %arg2[%c0_1, %c0_2] : memref<64x512xf32, #tpu.memory_space<vmem>>, vector<64x512xf32>
    %3 = arith.truncf %2 : vector<64x512xf32> to vector<64x512xbf16>
    %cst = arith.constant dense<0.000000e+00> : vector<8x512xf32>
    %4 = tpu.matmul %1, %3, %cst {dimension_numbers = #tpu.dot_dimension_numbers<[1], [0], [0], [1], [0, 0, 1, 1], [], []>} : vector<8x64xbf16>, vector<64x512xbf16>, vector<8x512xf32> -> vector<8x512xf32>
    %c0_3 = arith.constant 0 : index
    %c0_4 = arith.constant 0 : index
    %5 = vector.load %arg3[%c0_3, %c0_4] : memref<1x512xf32, #tpu.memory_space<vmem>>, vector<1x512xf32>
    %6 = vector.broadcast %5 : vector<1x512xf32> to vector<8x512xf32>
    %7 = arith.addf %4, %6 : vector<8x512xf32>
    %cst_5 = arith.constant 1.000000e-01 : f32
    %8 = vector.broadcast %cst_5 : f32 to vector<8x512xf32>
    %9 = arith.mulf %8, %7 : vector<8x512xf32>
    %10 = arith.maximumf %7, %9 : vector<8x512xf32>
    %11 = arith.truncf %10 : vector<8x512xf32> to vector<8x512xbf16>
    %c0_6 = arith.constant 0 : index
    %c0_7 = arith.constant 0 : index
    %12 = vector.load %arg4[%c0_6, %c0_7] : memref<512x128xbf16, #tpu.memory_space<vmem>>, vector<512x128xbf16>
    %cst_8 = arith.constant dense<0.000000e+00> : vector<8x128xf32>
    %13 = tpu.matmul %11, %12, %cst_8 {dimension_numbers = #tpu.dot_dimension_numbers<[1], [0], [0], [1], [0, 0, 1, 1], [], []>} : vector<8x512xbf16>, vector<512x128xbf16>, vector<8x128xf32> -> vector<8x128xf32>
    %c0_9 = arith.constant 0 : index
    %c0_10 = arith.constant 0 : index
    %14 = vector.load %arg5[%c0_9, %c0_10] : memref<1x128xf32, #tpu.memory_space<vmem>>, vector<1x128xf32>
    %15 = vector.broadcast %14 : vector<1x128xf32> to vector<8x128xf32>
    %16 = arith.addf %13, %15 : vector<8x128xf32>
    %17 = arith.truncf %16 : vector<8x128xf32> to vector<8x128xbf16>
    %c0_11 = arith.constant 0 : index
    %c0_12 = arith.constant 0 : index
    %18 = vector.load %arg6[%c0_11, %c0_12] : memref<8x128xbf16, #tpu.memory_space<vmem>>, vector<8x128xbf16>
    tpu.vector_store %arg6[%c0_11, %c0_12], %17 {strides = array<i32>} : memref<8x128xbf16, #tpu.memory_space<vmem>>, vector<8x128xbf16>,
    return
  }
  func.func @transform_0(%arg0: i32) -> (i32, i32) {
    %c0_i32 = arith.constant 0 : i32
    %c0_i32_0 = arith.constant 0 : i32
    return %arg0, %c0_i32 : i32, i32
  }
  func.func @transform_1(%arg0: i32) -> (i32, i32) {
    %c0_i32 = arith.constant 0 : i32
    %c0_i32_0 = arith.constant 0 : i32
    %c0_i32_1 = arith.constant 0 : i32
    return %c0_i32, %c0_i32_0 : i32, i32
  }
  func.func @transform_2(%arg0: i32) -> (i32, i32) {
    %c0_i32 = arith.constant 0 : i32
    %c0_i32_0 = arith.constant 0 : i32
    %c0_i32_1 = arith.constant 0 : i32
    return %c0_i32, %c0_i32_0 : i32, i32
  }
  func.func @transform_3(%arg0: i32) -> (i32, i32) {
    %c0_i32 = arith.constant 0 : i32
    %c0_i32_0 = arith.constant 0 : i32
    %c0_i32_1 = arith.constant 0 : i32
    return %c0_i32, %c0_i32_0 : i32, i32
  }
  func.func @transform_4(%arg0: i32) -> (i32, i32) {
    %c0_i32 = arith.constant 0 : i32
    %c0_i32_0 = arith.constant 0 : i32
    %c0_i32_1 = arith.constant 0 : i32
    return %c0_i32, %c0_i32_0 : i32, i32
  }
  func.func @transform_5(%arg0: i32) -> (i32, i32) {
    %c0_i32 = arith.constant 0 : i32
    %c0_i32_0 = arith.constant 0 : i32
    return %arg0, %c0_i32 : i32, i32
  }
}

</mosaic_0001>

<bundles_post_ra>
// kernel: newblock_forward.1
= control target key start
LH: loop header
LB: loop body
LE: loop exit
PB: predicated region body
PF: predicated region fallthrough
CT: control target
= control target key end

     0   :  { %v652_v3 = vmov 0   ;;  %vm93_vm0 = vcmask 523264   ;;  %s887_s1 = inlined_call_operand.vmem [shape: f32[64,512], index: 1, kind: input, shape index: {}]   ;;  %s888_s0 = inlined_call_operand.vmem [shape: f32[8,64], index: 0, kind: input, shape index: {}]   ;;  %s889_s3 = inlined_call_operand.vmem [shape: bf16[512,128], index: 3, kind: input, shape index: {}]   ;;  %s890_s2 = inlined_call_operand.vmem [shape: f32[1,512], index: 2, kind: input, shape index: {}]   ;;  %s891_s4 = inlined_call_operand.vmem [shape: f32[1,128], index: 4, kind: input, shape index: {}]   ;;  %s892_s5 = inlined_call_operand.vmem [shape: bf16[8,128], index: 5, kind: output, shape index: {}]  }
   0x1   :  { %v24_v0 = vld [vmem:[%s887_s1 + $0x8] sm:$0xff]  ;;  %v26_v2 = vld [vmem:[%s887_s1 + $0x18] sm:$0xff]  ;;  %129 = vmatprep.mubr.bf16.mxu0 %v652_v3  ;;  %170 = vmatprep.mubr.bf16.mxu1 %v652_v3  ;;  %v23_v6 = vld [vmem:[%s887_s1] sm:$0xff] }
   0x2   :  { %v28_v1 = vld [vmem:[%s887_s1 + $0x28] sm:$0xff]  ;;  %v30_v5 = vld [vmem:[%s887_s1 + $0x38] sm:$0xff]  ;;  %v27_v7 = vld [vmem:[%s887_s1 + $0x20] sm:$0xff] }
   0x3   :  { %v56_v4 = vpack.c.bf16 %v28_v1, %v24_v0  ;;  %v58_v8 = vpack.c.bf16 %v30_v5, %v26_v2  ;;  %v55_v9 = vpack.c.bf16 %v27_v7, %v23_v6  ;;  %v25_v10 = vld [vmem:[%s887_s1 + $0x10] sm:$0xff]  ;;  %v32_v12 = vld [vmem:[%s887_s1 + $0x48] sm:$0xff]  ;;  %v34_v15 = vld [vmem:[%s887_s1 + $0x58] sm:$0xff] }
   0x4   :  { %v29_v11 = vld [vmem:[%s887_s1 + $0x30] sm:$0xff]  ;;  %v36_v14 = vld [vmem:[%s887_s1 + $0x68] sm:$0xff]  ;;  %v38_v16 = vld [vmem:[%s887_s1 + $0x78] sm:$0xff] }
   0x5   :  { %97 = vmatprep.subr.bf16.mxu0 %v56_v4  ;;  %v57_v13 = vpack.c.bf16 %v29_v11, %v25_v10  ;;  %138 = vmatprep.subr.bf16.mxu1 %v58_v8  ;;  %v60_v17 = vpack.c.bf16 %v36_v14, %v32_v12  ;;  %v62_v18 = vpack.c.bf16 %v38_v16, %v34_v15  ;;  %v31_v19 = vld [vmem:[%s887_s1 + $0x40] sm:$0xff]  ;;  %v33_v21 = vld [vmem:[%s887_s1 + $0x50] sm:$0xff]  ;;  %v40_v24 = vld [vmem:[%s887_s1 + $0x88] sm:$0xff] }
   0x6   :  { %98 = vmatpush1.bf16.msra.mxu0 %v55_v9  ;;  %v35_v20 = vld [vmem:[%s887_s1 + $0x60] sm:$0xff]  ;;  %v37_v23 = vld [vmem:[%s887_s1 + $0x70] sm:$0xff]  ;;  %v44_v25 = vld [vmem:[%s887_s1 + $0xa8] sm:$0xff] }
   0x7   :  { %139 = vmatpush1.bf16.msra.mxu1 %v57_v13  ;;  %v59_v22 = vpack.c.bf16 %v35_v20, %v31_v19  ;;  %99 = vmatprep.subr.bf16.mxu0 %v60_v17  ;;  %v61_v26 = vpack.c.bf16 %v37_v23, %v33_v21  ;;  %v64_v27 = vpack.c.bf16 %v44_v25, %v40_v24  ;;  %v42_v28 = vld [vmem:[%s887_s1 + $0x98] sm:$0xff]  ;;  %v39_v30 = vld [vmem:[%s887_s1 + $0x80] sm:$0xff]  ;;  %v41_v33 = vld [vmem:[%s887_s1 + $0x90] sm:$0xff]  ;;  %v73_v19 = vlaneseq }
   0x8   :  { %140 = vmatprep.subr.bf16.mxu1 %v62_v18  ;;  %v46_v29 = vld [vmem:[%s887_s1 + $0xb8] sm:$0xff]  ;;  %v43_v32 = vld [vmem:[%s887_s1 + $0xa0] sm:$0xff]  ;;  %v45_v34 = vld [vmem:[%s887_s1 + $0xb0] sm:$0xff] }
   0x9   :  { %v66_v31 = vpack.c.bf16 %v46_v29, %v42_v28  ;;  %v63_v35 = vpack.c.bf16 %v43_v32, %v39_v30  ;;  %v48_v36 = vld [vmem:[%s887_s1 + $0xc8] sm:$0xff]  ;;  %v50_v38 = vld [vmem:[%s887_s1 + $0xd8] sm:$0xff]  ;;  %v65_v39 = vpack.c.bf16 %v45_v34, %v41_v33  ;;  %v47_v42 = vld [vmem:[%s887_s1 + $0xc0] sm:$0xff]  ;;  %v74_v20 = vshrl.u32 %v73_v19, 7 }
   0xa   :  { %100 = vmatpush1.bf16.msra.mxu0 %v59_v22  ;;  %v52_v37 = vld [vmem:[%s887_s1 + $0xe8] sm:$0xff]  ;;  %v54_v41 = vld [vmem:[%s887_s1 + $0xf8] sm:$0xff]  ;;  %v51_v43 = vld [vmem:[%s887_s1 + $0xe0] sm:$0xff] }
   0xb   :  { %141 = vmatpush1.bf16.msra.mxu1 %v61_v26  ;;  %101 = vmatprep.subr.bf16.mxu0 %v64_v27  ;;  %v68_v40 = vpack.c.bf16 %v52_v37, %v48_v36  ;;  %v70_v44 = vpack.c.bf16 %v54_v41, %v50_v38  ;;  %v49_v45 = vld [vmem:[%s887_s1 + $0xd0] sm:$0xff]  ;;  %v21_v47 = vld [vmem:[%s888_s0] sm:$0xff]  ;;  %v67_v48 = vpack.c.bf16 %v51_v43, %v47_v42  ;;  %v624_v55 = vld [vmem:[%s889_s3 + $0x48] sm:$0xff]   ;;  %v75_v21 = vsub.s32 0, %v74_v20 }
   0xc   :  { %142 = vmatprep.subr.bf16.mxu1 %v66_v31  ;;  %v53_v46 = vld [vmem:[%s887_s1 + $0xf0] sm:$0xff]  ;;  %v620_v49 = vld [vmem:[%s889_s3 + $0x40] sm:$0xff]   ;;  %v22_v53 = vpack.c.bf16 %v21_v47, %v21_v47  ;;  %v625_v56 = vld [vmem:[%s889_s3 + $0xc8] sm:$0xff]   ;;  %v83_v23 = vsub.s32 2, %v74_v20  ;;  %v79_v24 = vsub.s32 1, %v74_v20  ;;  %v87_v25 = vsub.s32 3, %v74_v20 }
   0xd   :  { %v69_v50 = vpack.c.bf16 %v53_v46, %v49_v45  ;;  %v621_v51 = vld [vmem:[%s889_s3 + $0xc0] sm:$0xff]   ;;  %v626_v57 = vld [vmem:[%s889_s3 + $0x8] sm:$0xff]   ;;  %v628_v59 = vld [vmem:[%s889_s3 + $0x50] sm:$0xff]  }
   0xe   :  { %102 = vmatpush1.bf16.msra.mxu0 %v63_v35  ;;  %v622_v52 = vld [vmem:[%s889_s3] sm:$0xff]   ;;  %v627_v58 = vld [vmem:[%s889_s3 + $0x88] sm:$0xff]   ;;  %v629_v60 = vld [vmem:[%s889_s3 + $0xd0] sm:$0xff]  }
   0xf   :  { %143 = vmatpush1.bf16.msra.mxu1 %v65_v39  ;;  %103 = vmatprep.subr.bf16.mxu0 %v68_v40  ;;  %v623_v54 = vld [vmem:[%s889_s3 + $0x80] sm:$0xff]   ;;  %v630_v61 = vld [vmem:[%s889_s3 + $0x10] sm:$0xff]   ;;  %v632_v63 = vld [vmem:[%s889_s3 + $0x58] sm:$0xff]  }
  0x10   :  { %144 = vmatprep.subr.bf16.mxu1 %v70_v44  ;;  %v631_v62 = vld [vmem:[%s889_s3 + $0x90] sm:$0xff]   ;;  %v633_v0 = vld [vmem:[%s889_s3 + $0xd8] sm:$0xff]   ;;  %v636_v3 = vld [vmem:[%s889_s3 + $0x60] sm:$0xff]  }
  0x11   :  { %v634_v1 = vld [vmem:[%s889_s3 + $0x18] sm:$0xff]   ;;  %v637_v4 = vld [vmem:[%s889_s3 + $0xe0] sm:$0xff]   ;;  %v640_v7 = vld [vmem:[%s889_s3 + $0x68] sm:$0xff]  }
  0x12   :  { %104 = vmatpush1.bf16.msra.mxu0 %v67_v48  ;;  %v635_v2 = vld [vmem:[%s889_s3 + $0x98] sm:$0xff]   ;;  %v638_v5 = vld [vmem:[%s889_s3 + $0x20] sm:$0xff]   ;;  %v641_v8 = vld [vmem:[%s889_s3 + $0xe8] sm:$0xff]  }
  0x13   :  { %145 = vmatpush1.bf16.msra.mxu1 %v69_v50  ;;  %575 = vmatprep.subr.bf16.mxu0 %v620_v49  ;;  %v639_v6 = vld [vmem:[%s889_s3 + $0xa0] sm:$0xff]   ;;  %v642_v9 = vld [vmem:[%s889_s3 + $0x28] sm:$0xff]   ;;  %v644_v11 = vld [vmem:[%s889_s3 + $0x70] sm:$0xff]  }
  0x14   :  { %597 = vmatprep.subr.bf16.mxu1 %v621_v51  ;;  %v643_v10 = vld [vmem:[%s889_s3 + $0xa8] sm:$0xff]   ;;  %v645_v12 = vld [vmem:[%s889_s3 + $0xf0] sm:$0xff]   ;;  %v648_v15 = vld [vmem:[%s889_s3 + $0x78] sm:$0xff]  }
  0x15   :  { %540 = vmatmul.mubr.msk.bf16.vlgmr.msra.gmra.mrb[0].mxu0 %vm93_vm0, %v22_v53  ;;  %v646_v13 = vld [vmem:[%s889_s3 + $0x30] sm:$0xff]   ;;  %v649_v16 = vld [vmem:[%s889_s3 + $0xf8] sm:$0xff]   ;;  %v71_v22 = vld [vmem:[%s890_s2] sm:$0xf] }
  0x16   :  { %541 = vmatmul.mubr.msk.bf16.vlgmr.msra.gmra.mrb[0].mxu1 %vm93_vm0, %v22_v53  ;;  %576 = vmatpush3.bf16.msra.mxu0 %v622_v52  ;;  %v647_v14 = vld [vmem:[%s889_s3 + $0xb0] sm:$0xff]   ;;  %v650_v17 = vld [vmem:[%s889_s3 + $0x38] sm:$0xff]   ;;  %v76_v26 = vrot.slane %v71_v22, %v75_v21  ;;  %v84_v27 = vrot.slane %v71_v22, %v83_v23  ;;  %v80_v28 = vrot.slane %v71_v22, %v79_v24 }
  0x17   :  { %598 = vmatpush3.bf16.msra.mxu1 %v623_v54  ;;  %577 = vmatprep.subr.bf16.mxu0 %v624_v55  ;;  %v651_v18 = vld [vmem:[%s889_s3 + $0xb8] sm:$0xff]   ;;  %v88_v29 = vrot.slane %v71_v22, %v87_v25 }
  0x18   :  { %599 = vmatprep.subr.bf16.mxu1 %v625_v56  ;;  %v542_v56 = vld [vmem:[%s891_s4] ss:$0 sm:$0xff] }
  0x1a   :  { %578 = vmatpush3.bf16.msra.mxu0 %v626_v57 }
  0x1b   :  { %600 = vmatpush3.bf16.msra.mxu1 %v627_v58  ;;  %579 = vmatprep.subr.bf16.mxu0 %v628_v59 }
  0x1c   :  { %601 = vmatprep.subr.bf16.mxu1 %v629_v60 }
  0x1e   :  { %580 = vmatpush3.bf16.msra.mxu0 %v630_v61 }
  0x1f   :  { %602 = vmatpush3.bf16.msra.mxu1 %v631_v62  ;;  %581 = vmatprep.subr.bf16.mxu0 %v632_v63 }
  0x20   :  { %603 = vmatprep.subr.bf16.mxu1 %v633_v0 }
  0x22   :  { %582 = vmatpush3.bf16.msra.mxu0 %v634_v1 }
  0x23   :  { %604 = vmatpush3.bf16.msra.mxu1 %v635_v2  ;;  %583 = vmatprep.subr.bf16.mxu0 %v636_v3 }
  0x24   :  { %605 = vmatprep.subr.bf16.mxu1 %v637_v4 }
  0x26   :  { %584 = vmatpush3.bf16.msra.mxu0 %v638_v5 }
  0x27   :  { %606 = vmatpush3.bf16.msra.mxu1 %v639_v6  ;;  %585 = vmatprep.subr.bf16.mxu0 %v640_v7 }
  0x28   :  { %607 = vmatprep.subr.bf16.mxu1 %v641_v8 }
  0x2a   :  { %586 = vmatpush3.bf16.msra.mxu0 %v642_v9 }
  0x2b   :  { %608 = vmatpush3.bf16.msra.mxu1 %v643_v10  ;;  %587 = vmatprep.subr.bf16.mxu0 %v644_v11 }
  0x2c   :  { %609 = vmatprep.subr.bf16.mxu1 %v645_v12 }
  0x2e   :  { %588 = vmatpush3.bf16.msra.mxu0 %v646_v13 }
  0x2f   :  { %610 = vmatpush3.bf16.msra.mxu1 %v647_v14  ;;  %589 = vmatprep.subr.bf16.mxu0 %v648_v15 }
  0x30   :  { %611 = vmatprep.subr.bf16.mxu1 %v649_v16 }
  0x32   :  { %590 = vmatpush3.bf16.msra.mxu0 %v650_v17 }
  0x33   :  { %612 = vmatpush3.bf16.msra.mxu1 %v651_v18 }
  0xe8   :  { %v131_v30 = vpop.f32.mrb[0].mxu0 }
  0xe9   :  { %v132_v31 = vadd.f32 %v131_v30, %v76_v26  ;;  %v172_v32 = vpop.f32.mrb[0].mxu1  ;;  %v133_v33 = vpop.f32.mrb[1].mxu0 }
  0xea   :  { %v173_v34 = vadd.f32 %v172_v32, %v84_v27  ;;  %v134_v35 = vadd.f32 %v133_v33, %v80_v28  ;;  %v174_v36 = vpop.f32.mrb[1].mxu1  ;;  %v135_v37 = vpop.f32.mrb[2].mxu0 }
  0xeb   :  { %v179_v38 = vmul.f32 0.1, %v132_v31  ;;  %v175_v39 = vadd.f32 %v174_v36, %v88_v29  ;;  %v176_v40 = vpop.f32.mrb[2].mxu1  ;;  %v136_v41 = vpop.f32.mrb[3].mxu0 }
  0xec   :  { %v181_v42 = vmul.f32 0.1, %v173_v34  ;;  %v180_v43 = vmul.f32 0.1, %v134_v35  ;;  %v177_v44 = vpop.f32.mrb[3].mxu1 }
  0xed   :  { %v183_v45 = vmax.f32 %v132_v31, %v179_v38  ;;  %v182_v46 = vmul.f32 0.1, %v175_v39 }
  0xee   :  { %v185_v47 = vmax.f32 %v173_v34, %v181_v42  ;;  %v184_v48 = vmax.f32 %v134_v35, %v180_v43 }
  0xef   :  { %v186_v49 = vmax.f32 %v175_v39, %v182_v46  ;;  %v187_v51 = vpack.c.bf16 %v183_v45, %v183_v45 }
  0xf0   :  { %v188_v50 = vpack.c.bf16 %v184_v48, %v184_v48  ;;  %v189_v53 = vpack.c.bf16 %v185_v47, %v185_v47 }
  0xf1   :  { %v190_v52 = vpack.c.bf16 %v186_v49, %v186_v49 }
  0xf2   :  { %486 = vmatprep.mubr.bf16.mxu0 %v188_v50 }
  0xf3   :  { %526 = vmatprep.mubr.bf16.mxu1 %v190_v52  ;;  %487 = vmatmul.mubr.bf16.vlgmr.msra.gmra.mrb[4].mxu0 %v187_v51 }
  0xf4   :  { %527 = vmatmul.mubr.bf16.vlgmr.msra.gmra.mrb[4].mxu1 %v189_v53 }
 0x1c6   :  { %v591_v54 = vpop.f32.mrb[4].mxu0 }
 0x1c7   :  { %v613_v55 = vpop.f32.mrb[4].mxu1  ;;  %v592_v57 = vpop.f32.mrb[5].mxu0 }
 0x1c8   :  { %v593_v58 = vadd.f32 %v592_v57, %v591_v54  ;;  %v614_v59 = vpop.f32.mrb[5].mxu1  ;;  %v594_v60 = vpop.f32.mrb[6].mxu0 }
 0x1c9   :  { %v615_v61 = vadd.f32 %v614_v59, %v613_v55  ;;  %v616_v62 = vpop.f32.mrb[6].mxu1  ;;  %v595_v63 = vpop.f32.mrb[7].mxu0 }
 0x1ca   :  { %v489_v0 = vadd.f32 %v593_v58, %v542_v56  ;;  %v617_v1 = vpop.f32.mrb[7].mxu1 }
 0x1cc   :  { %v529_v2 = vadd.f32 %v615_v61, %v489_v0 }
 0x1ce   :  { %v534_v3 = vpack.c.bf16 %v529_v2, %v529_v2 }
 0x1d0   :  { %535 = vst [vmem:[%s892_s5] sm:$0xf] %v534_v3 }

</bundles_post_ra>
